<compile_context>
chip_gen: v7x
topology: tpu7x:2x2x1
jax: 0.10.0
libtpu: 0.0.40
codegen_flags: <defaults>
</compile_context>

<pallas_src>
import functools

import jax
import jax.numpy as jnp
import numpy as np
from jax.experimental import pallas as pl
from jax.experimental.pallas import tpu as pltpu

_EPS = 1e-10


def _round_up(x, m):
    return -(-x // m) * m


def _vmem_capacity_bytes():
    try:
        cap = int(pltpu.get_tpu_info().vmem_capacity_bytes)
        if cap > 0:
            return cap
    except Exception:
        pass
    return 64 << 20  # conservative default (v7x per-TensorCore VMEM)


def _pick_tiles(n_rows, row_len, itemsize, vmem_cap):
    """Pick (rows_per_block, lanes_per_block).

    VMEM model per grid step: 2 inputs x 2 pipeline buffers (input dtype) plus
    ~10 block-sized f32 temporaries (casts, products, the masked log term).
    Budget ~60% of physical VMEM so the same picker adapts to v5e/v6e
    (128 MiB) and v7x (64 MiB per TensorCore).
    """
    per_elem_bytes = 4 * itemsize + 10 * 4
    elems = (vmem_cap * 6 // 10) // per_elem_bytes
    # Keep per-input blocks in the ~1..8 MiB HBM-streaming sweet spot.
    elems = max((1 << 20) // itemsize, min(elems, (8 << 20) // itemsize))

    if 8 * row_len <= elems:
        # Whole rows fit in one block: (tr, L), no lane chunking.
        tl = row_len
        tr = max(8, (elems // row_len) // 8 * 8)
        tr = min(tr, _round_up(n_rows, 8))
        # Prefer >= 2 row blocks (keeps both v7x TensorCores busy and gives
        # the software pipeline something to overlap) -- but the ~1 MiB block
        # floor has priority over step count.
        if n_rows > 8:
            tr_half = _round_up(-(-n_rows // 2), 8)
            if tr_half < tr and tr_half * row_len * itemsize >= (1 << 20):
                tr = tr_half
    else:
        # Rows too long for one block: chunk the lane axis, 8 rows per block.
        tr = 8
        tl = max(128, (elems // 8) // 128 * 128)
    return int(tr), int(tl)


def _sal_map_kernel(pred_ref, targ_ref, cc_ref, kl_ref, *scratch,
                    eps, row_len, lanes_per_block, n_l_chunks, mask_last_chunk):
    """One (rows_per_block, lanes_per_block) tile of the flattened maps.

    Grid = (row_blocks, lane_chunks); rows are "parallel", the lane axis is an
    "arbitrary" reduction accumulated in per-row f32 scratch.  Per row:
      cc_ref: negative Pearson correlation
      kl_ref: sum_j [t_n>0] t_n * (log t_n - log o_n)
              = (kA + log((sx+eps)/(sy+eps)) * kB) / (sy+eps)
        with kA = sum_{y>0} y*log(y/x), kB = sum_{y>0} y
      (one log per element; per-row constants hoisted out of the hot path).
    """
    l = pl.program_id(1)

    x = pred_ref[...].astype(jnp.float32)   # (tr, tl)
    y = targ_ref[...].astype(jnp.float32)   # (tr, tl)

    if mask_last_chunk:
        # The last lane chunk may run past the true row length; zero the
        # padded lanes so they contribute nothing to any partial sum.
        col = jax.lax.broadcasted_iota(jnp.int32, x.shape, 1) + l * lanes_per_block
        valid = col < row_len
        x = jnp.where(valid, x, 0.0)
        y = jnp.where(valid, y, 0.0)

    # Per-chunk partial sums (tree-reduced inside the chunk).
    sx = jnp.sum(x, axis=-1, keepdims=True)
    sy = jnp.sum(y, axis=-1, keepdims=True)
    sxx = jnp.sum(x * x, axis=-1, keepdims=True)
    syy = jnp.sum(y * y, axis=-1, keepdims=True)
    sxy = jnp.sum(x * y, axis=-1, keepdims=True)

    pos = y > 0.0   # == (t_n > 0) for non-negative saliency targets
    ka = jnp.sum(jnp.where(pos, y * jnp.log(y / x), 0.0), axis=-1, keepdims=True)
    kb = jnp.sum(jnp.where(pos, y, 0.0), axis=-1, keepdims=True)

    def finalize(SX, SY, SXX, SYY, SXY, KA, KB):
        # TODO(synk): single-pass moments can lose precision for very large L
        # or near-constant rows; switch to chunk-centered moments + Chan merge
        # if production maps require it.
        inv_l = jnp.float32(1.0 / row_len)
        cov = SXY - SX * SY * inv_l
        var_x = SXX - SX * SX * inv_l
        var_y = SYY - SY * SY * inv_l
        cc_ref[...] = -cov * jax.lax.rsqrt(var_x * var_y)   # rsqrt -> EUP slot
        sxe = SX + eps
        sye = SY + eps
        kl_ref[...] = (KA + jnp.log(sxe / sye) * KB) / sye   # (tr,1) only

    if n_l_chunks == 1:
        finalize(sx, sy, sxx, syy, sxy, ka, kb)
    else:
        sx_s, sy_s, sxx_s, syy_s, sxy_s, ka_s, kb_s = scratch

        @pl.when(l == 0)
        def _():
            sx_s[...] = sx
            sy_s[...] = sy
            sxx_s[...] = sxx
            syy_s[...] = syy
            sxy_s[...] = sxy
            ka_s[...] = ka
            kb_s[...] = kb

        @pl.when(l > 0)
        def _():
            sx_s[...] += sx
            sy_s[...] += sy
            sxx_s[...] += sxx
            syy_s[...] += syy
            sxy_s[...] += sxy
            ka_s[...] += ka
            kb_s[...] += kb

        @pl.when(l == n_l_chunks - 1)
        def _():
            finalize(sx_s[...], sy_s[...], sxx_s[...], syy_s[...],
                     sxy_s[...], ka_s[...], kb_s[...])


def _sal_map_partials(pred, target, *, eps=_EPS,
                      rows_per_block=None, lanes_per_block=None):
    """Run the fused map kernel; returns per-row (neg-CC, KL row-sum)."""
    shape = pred.shape
    L = int(shape[-1] * shape[-2])
    N = int(np.prod(shape[:-2]))

    # Keep the input dtype (e.g. bf16 halves HBM traffic); accumulate in f32.
    pred2 = pred.reshape(N, L)
    targ2 = target.reshape(N, L)

    itemsize = jnp.dtype(pred.dtype).itemsize
    vmem_cap = _vmem_capacity_bytes()
    tr, tl = _pick_tiles(N, L, itemsize, vmem_cap)
    if rows_per_block is not None:
        tr = int(rows_per_block)
        assert tr % 8 == 0, "rows_per_block must be a multiple of 8"
    if lanes_per_block is not None:
        tl = int(lanes_per_block)
        assert tl % 128 == 0 or tl == L, "lanes_per_block must be a multiple of 128"

    grid_n = -(-N // tr)
    grid_l = -(-L // tl)

    kernel = functools.partial(
        _sal_map_kernel, eps=float(eps), row_len=L, lanes_per_block=tl,
        n_l_chunks=grid_l, mask_last_chunk=(L % tl != 0))

    scratch_shapes = ([pltpu.VMEM((tr, 1), jnp.float32)] * 7) if grid_l > 1 else []

    # Explicit VMEM budget: 2 inputs x 2 pipeline buffers + ~10 f32 temps + slack.
    blk_in = tr * tl * itemsize
    blk_f32 = tr * tl * 4
    vmem_limit = 4 * blk_in + 10 * blk_f32 + (4 << 20)
    vmem_limit = max(32 << 20, min(vmem_limit, (vmem_cap * 9) // 10))

    cc_rows, kl_rows = pl.pallas_call(
        kernel,
        out_shape=(jax.ShapeDtypeStruct((N, 1), jnp.float32),
                   jax.ShapeDtypeStruct((N, 1), jnp.float32)),
        grid_spec=pltpu.PrefetchScalarGridSpec(
            num_scalar_prefetch=0,
            grid=(grid_n, grid_l),
            in_specs=[pl.BlockSpec((tr, tl), lambda i, l: (i, l)),
                      pl.BlockSpec((tr, tl), lambda i, l: (i, l))],
            out_specs=[pl.BlockSpec((tr, 1), lambda i, l: (i, 0)),
                       pl.BlockSpec((tr, 1), lambda i, l: (i, 0))],
            scratch_shapes=scratch_shapes),
        compiler_params=pltpu.CompilerParams(
            dimension_semantics=("parallel", "arbitrary"),
            vmem_limit_bytes=int(vmem_limit)),
    )(pred2, targ2)
    return cc_rows, kl_rows, N, L


def sal_graph_loss(output, target_map, output_node, target_node,
                   *, eps=_EPS, rows_per_block=None, lanes_per_block=None):
    """Pallas TPU implementation of SalGraphLoss.forward (f32 scalar)."""
    cc_rows, kl_rows, n_rows, row_len = _sal_map_partials(
        output, target_map, eps=eps,
        rows_per_block=rows_per_block, lanes_per_block=lanes_per_block)

    cc = jnp.mean(cc_rows[:, 0])
    # nn.KLDivLoss(reduction='mean') divides by the total element count.
    kl_map = jnp.sum(kl_rows[:, 0]) / jnp.float32(n_rows * row_len)

    # Graph-node KL: tiny (O(nodes*feat)); plain jnp, XLA fuses it with the
    # final scalar reductions (a dedicated pallas_call only wasted a launch).
    logp = output_node.astype(jnp.float32)
    t = target_node.astype(jnp.float32)
    node_pw = jnp.where(t > 0, t * (jnp.log(t) - logp), 0.0)
    kl_node = jnp.sum(node_pw) / jnp.float32(t.size)

    return 2.0 * kl_map + 1.0 * cc + 2.0 * kl_node


def _reference_loss(output, target_map, output_node, target_node, eps=_EPS):
    """Pure-JAX mirror of the PyTorch module (two-pass CC)."""
    out = output.astype(jnp.float32)
    tgt = target_map.astype(jnp.float32)

    def kl_div_mean(log_input, target):
        pw = jnp.where(target > 0, target * (jnp.log(target) - log_input), 0.0)
        return jnp.sum(pw) / pw.size

    o_norm = out / (jnp.sum(out, axis=(2, 3), keepdims=True) + eps)
    t_norm = tgt / (jnp.sum(tgt, axis=(2, 3), keepdims=True) + eps)
    kl_map = kl_div_mean(jnp.log(o_norm), t_norm)

    L = out.shape[-1] * out.shape[-2]
    p = out.reshape(-1, L)
    t = tgt.reshape(-1, L)
    pm = p - p.mean(axis=-1, keepdims=True)
    tm = t - t.mean(axis=-1, keepdims=True)
    r_num = (pm * tm).mean(axis=-1)
    r_den = jnp.sqrt((pm * pm).mean(axis=-1) * (tm * tm).mean(axis=-1))
    cc = jnp.mean(-r_num / r_den)

    kl_node = kl_div_mean(output_node.astype(jnp.float32),
                          target_node.astype(jnp.float32))
    return 2.0 * kl_map + 1.0 * cc + 2.0 * kl_node


if __name__ == "__main__":
    key = jax.random.PRNGKey(0)
    k1, k2, k3, k4 = jax.random.split(key, 4)
    B, C, H, W = 2, 4, 16, 16
    NODES, FEAT = 8, 32

    # Saliency-style maps: strictly positive predictions, non-negative targets.
    output = jax.random.uniform(k1, (B, C, H, W), jnp.float32, minval=0.05, maxval=1.0)
    target_map = jax.random.uniform(k2, (B, C, H, W), jnp.float32, minval=0.0, maxval=1.0)
    # Graph-node terms: KLDivLoss expects (log-probs, probs).
    output_node = jax.nn.log_softmax(
        jax.random.normal(k3, (B, NODES, FEAT), jnp.float32), axis=-1)
    target_node = jax.nn.softmax(
        jax.random.normal(k4, (B, NODES, FEAT), jnp.float32), axis=-1)

    ref = _reference_loss(output, target_map, output_node, target_node)

    # Auto-tiled path (single lane chunk for this small shape).
    loss = sal_graph_loss(output, target_map, output_node, target_node)
    loss = jax.block_until_ready(loss)
    assert bool(jnp.isfinite(loss)), loss
    assert jnp.allclose(loss, ref, atol=5e-5, rtol=5e-5), (loss, ref)

    # Exercise the lane-chunked (scratch accumulator) path as well.
    loss_chunked = sal_graph_loss(output, target_map, output_node, target_node,
                                  lanes_per_block=128)
    loss_chunked = jax.block_until_ready(loss_chunked)
    assert jnp.allclose(loss_chunked, ref, atol=5e-5, rtol=5e-5), (loss_chunked, ref)

    print("KERNEL_OK")
</pallas_src>

<mosaic_0001>
module attributes {stable_mosaic.version = 11 : i64} {
  func.func @_sal_map_kernel(%arg0: i32, %arg1: i32, %arg2: memref<8x256xf32, #tpu.memory_space<vmem>>, %arg3: memref<8x256xf32, #tpu.memory_space<vmem>>, %arg4: memref<8x1xf32, #tpu.memory_space<vmem>>, %arg5: memref<8x1xf32, #tpu.memory_space<vmem>>) attributes {dimension_semantics = [#tpu.dimension_semantics<parallel>, #tpu.dimension_semantics<arbitrary>], iteration_bounds = array<i64: 1, 1>, scalar_prefetch = 0 : i64, scratch_operands = 0 : i64, tpu.core_type = #tpu.core_type<tc>, window_params = [{transform_indices = @transform_0, window_bounds = array<i64: 8, 256>}, {transform_indices = @transform_1, window_bounds = array<i64: 8, 256>}, {transform_indices = @transform_2, window_bounds = array<i64: 8, 1>}, {transform_indices = @transform_3, window_bounds = array<i64: 8, 1>}]} {
    %c0 = arith.constant 0 : index
    %c0_0 = arith.constant 0 : index
    %0 = vector.load %arg2[%c0, %c0_0] : memref<8x256xf32, #tpu.memory_space<vmem>>, vector<8x256xf32>
    %c0_1 = arith.constant 0 : index
    %c0_2 = arith.constant 0 : index
    %1 = vector.load %arg3[%c0_1, %c0_2] : memref<8x256xf32, #tpu.memory_space<vmem>>, vector<8x256xf32>
    %cst = arith.constant dense<0.000000e+00> : vector<8xf32>
    %2 = vector.multi_reduction <add>, %0, %cst [1] : vector<8x256xf32> to vector<8xf32>
    %3 = vector.shape_cast %2 : vector<8xf32> to vector<8x1xf32>
    %cst_3 = arith.constant dense<0.000000e+00> : vector<8xf32>
    %4 = vector.multi_reduction <add>, %1, %cst_3 [1] : vector<8x256xf32> to vector<8xf32>
    %5 = vector.shape_cast %4 : vector<8xf32> to vector<8x1xf32>
    %6 = arith.mulf %0, %0 : vector<8x256xf32>
    %cst_4 = arith.constant dense<0.000000e+00> : vector<8xf32>
    %7 = vector.multi_reduction <add>, %6, %cst_4 [1] : vector<8x256xf32> to vector<8xf32>
    %8 = vector.shape_cast %7 : vector<8xf32> to vector<8x1xf32>
    %9 = arith.mulf %1, %1 : vector<8x256xf32>
    %cst_5 = arith.constant dense<0.000000e+00> : vector<8xf32>
    %10 = vector.multi_reduction <add>, %9, %cst_5 [1] : vector<8x256xf32> to vector<8xf32>
    %11 = vector.shape_cast %10 : vector<8xf32> to vector<8x1xf32>
    %12 = arith.mulf %0, %1 : vector<8x256xf32>
    %cst_6 = arith.constant dense<0.000000e+00> : vector<8xf32>
    %13 = vector.multi_reduction <add>, %12, %cst_6 [1] : vector<8x256xf32> to vector<8xf32>
    %14 = vector.shape_cast %13 : vector<8xf32> to vector<8x1xf32>
    %cst_7 = arith.constant 0.000000e+00 : f32
    %15 = vector.broadcast %cst_7 : f32 to vector<8x256xf32>
    %16 = arith.cmpf ogt, %1, %15 : vector<8x256xf32>
    %17 = arith.divf %1, %0 : vector<8x256xf32>
    %18 = math.log %17 : vector<8x256xf32>
    %19 = arith.mulf %1, %18 : vector<8x256xf32>
    %cst_8 = arith.constant 0.000000e+00 : f32
    %20 = vector.broadcast %cst_8 : f32 to vector<8x256xf32>
    %21 = arith.select %16, %19, %20 : vector<8x256xi1>, vector<8x256xf32>
    %cst_9 = arith.constant dense<0.000000e+00> : vector<8xf32>
    %22 = vector.multi_reduction <add>, %21, %cst_9 [1] : vector<8x256xf32> to vector<8xf32>
    %23 = vector.shape_cast %22 : vector<8xf32> to vector<8x1xf32>
    %cst_10 = arith.constant 0.000000e+00 : f32
    %24 = vector.broadcast %cst_10 : f32 to vector<8x256xf32>
    %25 = arith.select %16, %1, %24 : vector<8x256xi1>, vector<8x256xf32>
    %cst_11 = arith.constant dense<0.000000e+00> : vector<8xf32>
    %26 = vector.multi_reduction <add>, %25, %cst_11 [1] : vector<8x256xf32> to vector<8xf32>
    %27 = vector.shape_cast %26 : vector<8xf32> to vector<8x1xf32>
    %28 = arith.mulf %3, %5 : vector<8x1xf32>
    %cst_12 = arith.constant 3.906250e-03 : f32
    %29 = vector.broadcast %cst_12 : f32 to vector<8x1xf32>
    %30 = arith.mulf %28, %29 : vector<8x1xf32>
    %31 = arith.subf %14, %30 : vector<8x1xf32>
    %32 = arith.mulf %3, %3 : vector<8x1xf32>
    %cst_13 = arith.constant 3.906250e-03 : f32
    %33 = vector.broadcast %cst_13 : f32 to vector<8x1xf32>
    %34 = arith.mulf %32, %33 : vector<8x1xf32>
    %35 = arith.subf %8, %34 : vector<8x1xf32>
    %36 = arith.mulf %5, %5 : vector<8x1xf32>
    %cst_14 = arith.constant 3.906250e-03 : f32
    %37 = vector.broadcast %cst_14 : f32 to vector<8x1xf32>
    %38 = arith.mulf %36, %37 : vector<8x1xf32>
    %39 = arith.subf %11, %38 : vector<8x1xf32>
    %cst_15 = arith.constant 0.000000e+00 : f32
    %40 = vector.broadcast %cst_15 : f32 to vector<8x1xf32>
    %41 = arith.subf %40, %31 : vector<8x1xf32>
    %42 = arith.mulf %35, %39 : vector<8x1xf32>
    %43 = math.rsqrt %42 : vector<8x1xf32>
    %44 = arith.mulf %41, %43 : vector<8x1xf32>
    %c0_16 = arith.constant 0 : index
    %c0_17 = arith.constant 0 : index
    %45 = vector.load %arg4[%c0_16, %c0_17] : memref<8x1xf32, #tpu.memory_space<vmem>>, vector<8x1xf32>
    tpu.vector_store %arg4[%c0_16, %c0_17], %44 {strides = array<i32>} : memref<8x1xf32, #tpu.memory_space<vmem>>, vector<8x1xf32>,
    %cst_18 = arith.constant 1.000000e-10 : f32
    %46 = vector.broadcast %cst_18 : f32 to vector<8x1xf32>
    %47 = arith.addf %3, %46 : vector<8x1xf32>
    %cst_19 = arith.constant 1.000000e-10 : f32
    %48 = vector.broadcast %cst_19 : f32 to vector<8x1xf32>
    %49 = arith.addf %5, %48 : vector<8x1xf32>
    %50 = arith.divf %47, %49 : vector<8x1xf32>
    %51 = math.log %50 : vector<8x1xf32>
    %52 = arith.mulf %51, %27 : vector<8x1xf32>
    %53 = arith.addf %23, %52 : vector<8x1xf32>
    %54 = arith.divf %53, %49 : vector<8x1xf32>
    %c0_20 = arith.constant 0 : index
    %c0_21 = arith.constant 0 : index
    %55 = vector.load %arg5[%c0_20, %c0_21] : memref<8x1xf32, #tpu.memory_space<vmem>>, vector<8x1xf32>
    tpu.vector_store %arg5[%c0_20, %c0_21], %54 {strides = array<i32>} : memref<8x1xf32, #tpu.memory_space<vmem>>, vector<8x1xf32>,
    return
  }
  func.func @transform_0(%arg0: i32, %arg1: i32) -> (i32, i32) {
    %c0_i32 = arith.constant 0 : i32
    return %arg0, %arg1 : i32, i32
  }
  func.func @transform_1(%arg0: i32, %arg1: i32) -> (i32, i32) {
    %c0_i32 = arith.constant 0 : i32
    return %arg0, %arg1 : i32, i32
  }
  func.func @transform_2(%arg0: i32, %arg1: i32) -> (i32, i32) {
    %c0_i32 = arith.constant 0 : i32
    %c0_i32_0 = arith.constant 0 : i32
    return %arg0, %c0_i32 : i32, i32
  }
  func.func @transform_3(%arg0: i32, %arg1: i32) -> (i32, i32) {
    %c0_i32 = arith.constant 0 : i32
    %c0_i32_0 = arith.constant 0 : i32
    return %arg0, %c0_i32 : i32, i32
  }
}

</mosaic_0001>

<bundles_post_ra>
// kernel: tpu_custom_call.1
= control target key start
LH: loop header
LB: loop body
LE: loop exit
PB: predicated region body
PF: predicated region fallthrough
CT: control target
= control target key end

     0   :  { %9 = vsyncpa [#allocation3], 0  ;;  %s239_s0 = inlined_call_operand.hbm [shape: f32[8,256], index: 0, kind: input, shape index: {}]   ;;  %s240_s1 = inlined_call_operand.hbm [shape: f32[8,256], index: 1, kind: input, shape index: {}]   ;;  %s241_s2 = inlined_call_operand.vmem [shape: f32[8,1], index: 2, kind: output, shape index: {0}]   ;;  %s242_s3 = inlined_call_operand.vmem [shape: f32[8,1], index: 3, kind: output, shape index: {1}]  }
   0x1   :  { %10 = vsyncpa [#allocation5], 0  ;;  %s183_s12 = smov [#allocation2]   ;;  %s184_s14 = smov [#allocation4]  }
   0x2   :  { %s17_s13 = sshll.u32 %s183_s12, 4  ;;  %s27_s15 = sshll.u32 %s184_s14, 4  ;;  %s18_s13 = int_to_ptr.vmem [resolvable:$true] %s17_s13  ;;  %s28_s15 = int_to_ptr.vmem [resolvable:$true] %s27_s15 }
   0x3   :  { %s135_s18 = scalar_lea.hbm %s239_s0, 256 }
   0x4   :  { %p136_p0 = scmp.ne.s32.totalorder %s239_s0, %s135_s18  ;;  %p139_p1 = scmp.lt.u32.totalorder %s135_s18, %s239_s0 }
   0x6   :  { %p141_p2 = pnand %p139_p1, %p136_p0 }
   0x8   :  { %144 = shalt.err (!%p141_p2)
}
   0x9   :  { %s145_s23 = scalar_lea.vmem %s18_s13, 256  ;;  %p150_p4 = scmp.lt.s32.totalorder %s18_s13, %s18_s13 }
   0xa   :  { %p146_p3 = scmp.ne.s32.totalorder %s18_s13, %s145_s23  ;;  %p151_p5 = scmp.lt.s32.totalorder %s145_s23, %s145_s23 }
   0xc   :  { %p152_p6 = por %p151_p5, %p150_p4 }
   0xe   :  { %p153_p7 = pnand %p152_p6, %p146_p3 }
  0x10   :  { %156 = shalt.err (!%p153_p7)
}
  0x11   :  { %20 = dma.hbm_to_vmem [thread:$0]  %s239_s0, 256, %s18_s13, [#allocation3]  }
  0x12   :  { %s157_s28 = scalar_lea.hbm %s240_s1, 256 }
  0x13   :  { %p158_p8 = scmp.ne.s32.totalorder %s240_s1, %s157_s28  ;;  %p161_p9 = scmp.lt.u32.totalorder %s157_s28, %s240_s1 }
  0x15   :  { %p163_p10 = pnand %p161_p9, %p158_p8 }
  0x17   :  { %166 = shalt.err (!%p163_p10)
}
  0x18   :  { %s167_s6 = scalar_lea.vmem %s28_s15, 256  ;;  %p172_p12 = scmp.lt.s32.totalorder %s28_s15, %s28_s15 }
  0x19   :  { %p168_p11 = scmp.ne.s32.totalorder %s28_s15, %s167_s6  ;;  %p173_p13 = scmp.lt.s32.totalorder %s167_s6, %s167_s6 }
  0x1b   :  { %p174_p0 = por %p173_p13, %p172_p12 }
  0x1d   :  { %p175_p1 = pnand %p174_p0, %p168_p11 }
  0x1f   :  { %178 = shalt.err (!%p175_p1)
}
  0x20   :  { %30 = dma.hbm_to_vmem [thread:$0]  %s240_s1, 256, %s28_s15, [#allocation5]  }
  0x21   :  { %179 = dma.done.wait [#allocation3], 256  }
  0x22   :  { %180 = vsyncadd [#allocation3], 4294967040 }
  0x23   :  { %181 = dma.done.wait [#allocation5], 256  }
  0x24   :  { %182 = vsyncadd [#allocation5], 4294967040  ;;  %v39_v0 = vld [vmem:[#allocation4] sm:$0xff]  ;;  %v40_v1 = vld [vmem:[#allocation4 + $0x8] sm:$0xff]  ;;  %vm97_vm2 = vcmask 7168  }
  0x25   :  { %v37_v2 = vld [vmem:[#allocation2] sm:$0xff]  ;;  %v44_v3 = vadd.f32 %v40_v1, %v39_v0  ;;  %v38_v4 = vld [vmem:[#allocation2 + $0x8] sm:$0xff]  ;;  %v52_v7 = vmul.f32 %v39_v0, %v39_v0  ;;  %v53_v8 = vmul.f32 %v40_v1, %v40_v1  ;;  %vm62_vm0 = vcmp.gt.f32.partialorder %v39_v0, 0.0 }
  0x26   :  { %v47_v5 = vmul.f32 %v37_v2, %v37_v2  ;;  %121 = vrcp.f32 %v37_v2  ;;  %v48_v6 = vmul.f32 %v38_v4, %v38_v4  ;;  %v41_v9 = vadd.f32 %v38_v4, %v37_v2 }
  0x27   :  { %123 = vrcp.f32 %v38_v4  ;;  %45 = vadd.xlane.f32.xlu0 %v44_v3  ;;  %v57_v10 = vmul.f32 %v39_v0, %v37_v2  ;;  %v58_v11 = vmul.f32 %v40_v1, %v38_v4  ;;  %vm63_vm1 = vcmp.gt.f32.partialorder %v40_v1, 0.0 }
  0x28   :  { %v49_v12 = vadd.f32 %v48_v6, %v47_v5  ;;  %v54_v13 = vadd.f32 %v53_v8, %v52_v7  ;;  %v79_v15 = vsel %vm62_vm0, %v39_v0, 0.0  ;;  %v80_v16 = vsel %vm63_vm1, %v40_v1, 0.0 }
  0x29   :  { %v59_v14 = vadd.f32 %v58_v11, %v57_v10  ;;  %v81_v17 = vadd.f32 %v80_v16, %v79_v15 }
  0x2a   :  { %50 = vadd.xlane.f32.xlu1 %v49_v12 }
  0x2b   :  { %42 = vadd.xlane.f32.xlu0 %v41_v9 }
  0x2e   :  { %55 = vadd.xlane.f32.xlu1 %v54_v13 }
  0x2f   :  { %60 = vadd.xlane.f32.xlu0 %v59_v14 }
  0x30   :  { %v122_v18 = vpop.eup %121 }
  0x31   :  { %v124_v19 = vpop.eup %123  ;;  %v65_v20 = vmul.f32 %v122_v18, %v39_v0 }
  0x32   :  { %v67_v21 = vmul.f32 %v124_v19, %v40_v1  ;;  %82 = vadd.xlane.f32.xlu1 %v81_v17 }
  0x33   :  { %125 = vlog2.f32 %v65_v20 }
  0x34   :  { %127 = vlog2.f32 %v67_v21 }
  0x3d   :  { %v126_v22 = vpop.eup %125 }
  0x3e   :  { %v128_v23 = vpop.eup %127  ;;  %v69_v24 = vmul.f32 0.6931472, %v126_v22 }
  0x3f   :  { %v71_v25 = vmul.f32 0.6931472, %v128_v23 }
  0x40   :  { %v72_v26 = vmul.f32 %v69_v24, %v39_v0 }
  0x41   :  { %v73_v27 = vmul.f32 %v71_v25, %v40_v1 }
  0x42   :  { %v74_v28 = vsel %vm62_vm0, %v72_v26, 0.0 }
  0x43   :  { %v75_v29 = vsel %vm63_vm1, %v73_v27, 0.0 }
  0x44   :  { %v76_v30 = vadd.f32 %v75_v29, %v74_v28 }
  0x46   :  { %77 = vadd.xlane.f32.xlu0 %v76_v30 }
  0xb4   :  { %v46_v31 = vpop.xlane.xlu0 %45 }
  0xb5   :  { %v100_v32 = vadd.f32 1e-10, %v46_v31  ;;  %v90_v34 = vmul.f32 %v46_v31, %v46_v31 }
  0xb7   :  { %129 = vrcp.f32 %v100_v32  ;;  %v51_v33 = vpop.xlane.xlu1 %50  ;;  %v91_v38 = vmul.f32 0.00390625, %v90_v34 }
  0xb8   :  { %v43_v35 = vpop.xlane.xlu0 %42 }
  0xb9   :  { %v87_v36 = vmul.f32 %v43_v35, %v43_v35  ;;  %v99_v42 = vadd.f32 1e-10, %v43_v35  ;;  %v84_v43 = vmul.f32 %v46_v31, %v43_v35 }
  0xbb   :  { %v88_v37 = vmul.f32 0.00390625, %v87_v36  ;;  %v56_v39 = vpop.xlane.xlu1 %55  ;;  %v85_v47 = vmul.f32 0.00390625, %v84_v43 }
  0xbc   :  { %v92_v41 = vsub.f32 %v56_v39, %v91_v38  ;;  %v61_v48 = vpop.xlane.xlu0 %60 }
  0xbd   :  { %v89_v40 = vsub.f32 %v51_v33, %v88_v37  ;;  %v86_v49 = vsub.f32 %v61_v48, %v85_v47 }
  0xbf   :  { %v94_v44 = vmul.f32 %v92_v41, %v89_v40  ;;  %v93_v50 = vsub.f32 0.0, %v86_v49  ;;  %v83_v54 = vpop.xlane.xlu1 %82 }
  0xc1   :  { %v130_v45 = vpop.eup %129  ;;  %131 = vrsqrt.f32 %v94_v44 }
  0xc2   :  { %v102_v46 = vmul.f32 %v130_v45, %v99_v42 }
  0xc4   :  { %133 = vlog2.f32 %v102_v46 }
  0xcb   :  { %v132_v51 = vpop.eup %131 }
  0xcc   :  { %v96_v52 = vmul.f32 %v132_v51, %v93_v50 }
  0xce   :  { %v134_v53 = vpop.eup %133  ;;  %98 = vst.msk [vmem:[%s241_s2] sm:$0xff] %vm97_vm2, %v96_v52 }
  0xcf   :  { %v104_v55 = vmul.f32 0.6931472, %v134_v53 }
  0xd1   :  { %v105_v56 = vmul.f32 %v104_v55, %v83_v54 }
  0xd3   :  { %v78_v57 = vpop.xlane.xlu0 %77 }
  0xd4   :  { %v106_v58 = vadd.f32 %v105_v56, %v78_v57 }
  0xd6   :  { %v107_v59 = vmul.f32 %v130_v45, %v106_v58 }
  0xd8   :  { %108 = vst.msk [vmem:[%s242_s3] sm:$0xff] %vm97_vm2, %v107_v59 }
  0xd9   :  { %117 = vsyncpa [#allocation3], 1 }
  0xda   :  { %118 = vsyncpa [#allocation5], 1 }

</bundles_post_ra>
